<compile_context>
chip_gen: v5e
topology: v5e:2x2
jax: 0.10.0
libtpu: 0.0.40
codegen_flags: <defaults>
</compile_context>

<pallas_src>
import functools

import jax
import jax.numpy as jnp
from jax.experimental import pallas as pl
from jax.experimental.pallas import tpu as pltpu

EPS = 1e-10

# Pipelined input working set: 2 inputs x 2 pipeline buffers x (TN, TD).
# Sized against the 32 MiB scoped-VMEM default of v6e / v7x (v7x physical VMEM
# is 64 MiB; v5e's scoped default is only 16 MiB -> raised via vmem_limit_bytes).
_INPUT_VMEM_BUDGET = 24 << 20
_VMEM_LIMIT_BYTES = 32 << 20


def _partial_sums_kernel(yhat_ref, y_ref, sq_ref, ab_ref, *,
                         tn, n_rows, rtiles_ps, needs_mask):
    """Grid = (row_splits, col_tiles, row_tiles_per_split); reduction axis last.

    sq_ref / ab_ref are (1, TD) VMEM-resident accumulators (output index_map is
    constant along the reduction axis).  They hold raw partial sums
    sum(dis^2) / sum(|dis|) for this (split, column-tile); the /N, sqrt, and the
    combine across splits / lane-folds happen in the O(D) wrapper epilogue.
    """
    pid = pl.program_id(2)

    @pl.when(pid == 0)
    def _init():
        sq_ref[...] = jnp.zeros_like(sq_ref)
        ab_ref[...] = jnp.zeros_like(ab_ref)

    # Up-cast in-register: HBM traffic stays at the input dtype (bf16/int32/...).
    dis = yhat_ref[...].astype(jnp.float32) - y_ref[...].astype(jnp.float32) + EPS

    if needs_mask:
        # Masks both the partial last row tile and the duplicated (clamped)
        # tiles of the last row split.  Compiled out when coverage is exact.
        s = pl.program_id(0)
        local = jax.lax.broadcasted_iota(jnp.int32, dis.shape, 0)
        global_rows = (s * rtiles_ps + pid) * tn + local
        dis = jnp.where(global_rows < n_rows, dis, 0.0)

    sq_ref[...] += jnp.sum(dis * dis, axis=0, keepdims=True)
    ab_ref[...] += jnp.sum(jnp.abs(dis), axis=0, keepdims=True)


def _choose_lane_fold(n, d, max_fold=128):
    """Fold k rows into lanes so the kernel's last dim is 128-lane dense."""
    if d % 128 == 0:
        return 1
    for k in range(2, max_fold + 1):
        if n % k == 0 and (k * d) % 128 == 0:
            return k
    if d < 128:  # second best: at least fill one vreg's lanes
        for k in range(2, max_fold + 1):
            if n % k == 0 and k * d >= 128:
                return k
    return 1


def rmse_loss(yhat: jax.Array, y: jax.Array, *, tn=None, td=None, n_splits=None):
    """Pallas equivalent of RMSELoss.forward. Returns (rmse, mae) reduced over dim 0."""
    assert yhat.shape == y.shape and yhat.ndim in (1, 2)
    was_1d = yhat.ndim == 1
    if was_1d:
        yhat, y = yhat[:, None], y[:, None]
    n, d = yhat.shape
    inv_n = 1.0 / n

    # Lane-density fold (free row-major reshape in the wrapper).
    fold = _choose_lane_fold(n, d)
    n_rows, d_eff = n // fold, d * fold
    yhat2, y2 = yhat.reshape(n_rows, d_eff), y.reshape(n_rows, d_eff)

    isz1 = jnp.dtype(yhat.dtype).itemsize
    isz2 = jnp.dtype(y.dtype).itemsize
    pack = max(8, 32 // min(isz1, isz2))   # sublane packing: f32->8, bf16->16, int8->32

    # Column tiling only if even a minimal (pack-row) tile over the full width
    # would blow the budget; td = d_eff keeps DMAs contiguous on single-TC chips.
    if td is None:
        td = d_eff
        if 2 * d_eff * (isz1 + isz2) * pack > _INPUT_VMEM_BUDGET and d_eff % 128 == 0:
            for cand in (4096, 2048, 1024, 512, 256, 128):
                if d_eff % cand == 0:
                    td = cand
                    break
    assert d_eff % td == 0, "column tile must divide the (folded) feature dim"
    col_tiles = d_eff // td

    # Row tile: largest pack-aligned TN whose pipelined working set fits the budget.
    if tn is None:
        rows = _INPUT_VMEM_BUDGET // (2 * td * (isz1 + isz2))
        rows = max(pack, (rows // pack) * pack)
        tn = n_rows if rows >= n_rows else rows
    elif tn >= n_rows:
        tn = n_rows
    else:
        tn = max(8, (tn // 8) * 8)

    row_tiles = pl.cdiv(n_rows, tn)

    # 2-way row split feeds both TensorCores on dual-TC chips (v7x) even when
    # col_tiles == 1.  Enable by default only when the duplicated masked tile
    # (odd row_tiles) is absent or a small fraction of the work.
    if n_splits is None:
        n_splits = 2 if row_tiles >= 2 and (row_tiles % 2 == 0 or row_tiles >= 8) else 1
    if td % 128 != 0:        # keep all output blocks strictly (x8, x128)-friendly
        n_splits = 1
    n_splits = max(1, min(n_splits, row_tiles))
    rtiles_ps = pl.cdiv(row_tiles, n_splits)

    needs_mask = (n_splits * rtiles_ps * tn) != n_rows
    needs_clamp = (n_splits * rtiles_ps) > row_tiles   # last split has surplus tiles

    if needs_clamp:
        def in_map(s, j, i):
            # Clamp so surplus tiles re-read the last valid block (never a fully
            # out-of-bounds DMA); the in-kernel mask zeroes their contribution.
            return (jnp.minimum(s * rtiles_ps + i, row_tiles - 1), j)
    else:
        def in_map(s, j, i):
            return (s * rtiles_ps + i, j)

    # Per-split partial sums live in lane-concatenated columns: (1, n_splits * d_eff).
    def out_map(s, j, i):
        return (0, s * col_tiles + j)

    kernel = functools.partial(_partial_sums_kernel, tn=tn, n_rows=n_rows,
                               rtiles_ps=rtiles_ps, needs_mask=needs_mask)

    out_bytes = 2 * n_splits * d_eff * 4
    cost = pl.CostEstimate(
        flops=6 * n * d,
        transcendentals=0,
        bytes_accessed=n * d * (isz1 + isz2) + out_bytes,
    )

    sumsq, sumab = pl.pallas_call(
        kernel,
        out_shape=(
            jax.ShapeDtypeStruct((1, n_splits * d_eff), jnp.float32),
            jax.ShapeDtypeStruct((1, n_splits * d_eff), jnp.float32),
        ),
        grid_spec=pltpu.PrefetchScalarGridSpec(
            num_scalar_prefetch=0,
            grid=(n_splits, col_tiles, rtiles_ps),
            in_specs=[
                pl.BlockSpec((tn, td), in_map),
                pl.BlockSpec((tn, td), in_map),
            ],
            out_specs=[
                # Constant along the reduction axis -> VMEM-resident accumulator.
                pl.BlockSpec((1, td), out_map),
                pl.BlockSpec((1, td), out_map),
            ],
        ),
        compiler_params=pltpu.CompilerParams(
            dimension_semantics=("parallel", "parallel", "arbitrary"),
            vmem_limit_bytes=_VMEM_LIMIT_BYTES,
        ),
        cost_estimate=cost,
    )(yhat2, y2)

    # O(D) epilogue: combine row splits and lane folds, then /N and sqrt.
    sumsq = sumsq.reshape(n_splits * fold, d).sum(axis=0)
    sumab = sumab.reshape(n_splits * fold, d).sum(axis=0)
    rmse = jnp.sqrt(sumsq * inv_n)
    mae = sumab * inv_n
    if was_1d:
        rmse, mae = rmse[0], mae[0]
    return rmse, mae


def compute_loss(rating_true, rating_pred):
    """Mirrors model/Rating_att_pre.py::compute_loss."""
    return rmse_loss(rating_true, rating_pred)


def _reference(yhat, y):
    yhat = yhat.astype(jnp.float32)
    y = y.astype(jnp.float32)
    dis = yhat - y + EPS
    n = y.shape[0]
    mae = jnp.sum(jnp.abs(dis), axis=0) / n
    rmse = jnp.sqrt(jnp.sum(dis * dis, axis=0) / n)
    return rmse, mae


if __name__ == "__main__":
    key = jax.random.PRNGKey(0)
    k1, k2, k3, k4, k5, k6, k7 = jax.random.split(key, 7)

    # Test 1: small f32 score matrix; lane fold (8, 32) -> (2, 128).
    yhat = jax.random.normal(k1, (8, 32), jnp.float32)
    y = jax.random.normal(k2, (8, 32), jnp.float32)
    rmse, mae = rmse_loss(yhat, y)
    jax.block_until_ready((rmse, mae))
    rr, mr = _reference(yhat, y)
    assert jnp.allclose(rmse, rr, atol=1e-6, rtol=1e-6)
    assert jnp.allclose(mae, mr, atol=1e-6, rtol=1e-6)

    # Test 2: bf16 inputs, non-128-aligned D; fold (20, 160) -> (5, 640),
    # in-register f32 upcast.
    yhat2 = jax.random.normal(k3, (20, 160), jnp.bfloat16)
    y2 = jax.random.normal(k4, (20, 160), jnp.bfloat16)
    rmse2, mae2 = rmse_loss(yhat2, y2)
    jax.block_until_ready((rmse2, mae2))
    rr2, mr2 = _reference(yhat2, y2)
    assert jnp.allclose(rmse2, rr2, atol=1e-5, rtol=1e-5)
    assert jnp.allclose(mae2, mr2, atol=1e-5, rtol=1e-5)

    # Test 3: multi-row-tile pipeline + explicit 2-way row split + partial-tile
    # mask + clamped surplus tile (row_tiles = 7, rtiles_ps = 4).
    yhat3 = jax.random.normal(k5, (200, 128), jnp.float32)
    y3 = jax.random.normal(k6, (200, 128), jnp.float32)
    rmse3, mae3 = rmse_loss(yhat3, y3, tn=32, n_splits=2)
    jax.block_until_ready((rmse3, mae3))
    rr3, mr3 = _reference(yhat3, y3)
    assert jnp.allclose(rmse3, rr3, atol=1e-5, rtol=1e-5)
    assert jnp.allclose(mae3, mr3, atol=1e-5, rtol=1e-5)

    # Test 4: the module's real usage (loss_trust): 1-D int labels vs f32 scores;
    # lane fold (384, 1) -> (3, 128).
    scores = jax.nn.sigmoid(jax.random.normal(k7, (384,), jnp.float32))
    labels = (scores > 0.5).astype(jnp.int32)
    rmse4, mae4 = compute_loss(labels, scores)
    jax.block_until_ready((rmse4, mae4))
    rr4, mr4 = _reference(labels.astype(jnp.float32)[:, None], scores[:, None])
    assert jnp.allclose(rmse4, rr4[0], atol=1e-6, rtol=1e-6)
    assert jnp.allclose(mae4, mr4[0], atol=1e-6, rtol=1e-6)

    print("KERNEL_OK")
</pallas_src>

<mosaic_0001>
module attributes {stable_mosaic.version = 11 : i64} {
  func.func @_partial_sums_kernel(%arg0: i32, %arg1: i32, %arg2: i32, %arg3: memref<2x128xf32, #tpu.memory_space<vmem>>, %arg4: memref<2x128xf32, #tpu.memory_space<vmem>>, %arg5: memref<1x128xf32, #tpu.memory_space<vmem>>, %arg6: memref<1x128xf32, #tpu.memory_space<vmem>>) attributes {dimension_semantics = [#tpu.dimension_semantics<parallel>, #tpu.dimension_semantics<parallel>, #tpu.dimension_semantics<arbitrary>], iteration_bounds = array<i64: 1, 1, 1>, scalar_prefetch = 0 : i64, scratch_operands = 0 : i64, tpu.core_type = #tpu.core_type<tc>, window_params = [{transform_indices = @transform_0, window_bounds = array<i64: 2, 128>}, {transform_indices = @transform_1, window_bounds = array<i64: 2, 128>}, {transform_indices = @transform_2, window_bounds = array<i64: 1, 128>}, {transform_indices = @transform_3, window_bounds = array<i64: 1, 128>}]} {
    %c0_i32 = arith.constant 0 : i32
    %0 = arith.cmpi eq, %arg2, %c0_i32 : i32
    %1 = arith.extui %0 : i1 to i32
    %c0_i32_0 = arith.constant 0 : i32
    %2 = arith.cmpi ne, %1, %c0_i32_0 : i32
    scf.if %2 {
      %cst_14 = arith.constant 0.000000e+00 : f32
      %20 = vector.broadcast %cst_14 : f32 to vector<1x128xf32>
      %c0_15 = arith.constant 0 : index
      %c0_16 = arith.constant 0 : index
      %21 = vector.load %arg5[%c0_15, %c0_16] : memref<1x128xf32, #tpu.memory_space<vmem>>, vector<1x128xf32>
      tpu.vector_store %arg5[%c0_15, %c0_16], %20 {strides = array<i32>} : memref<1x128xf32, #tpu.memory_space<vmem>>, vector<1x128xf32>,
      %cst_17 = arith.constant 0.000000e+00 : f32
      %22 = vector.broadcast %cst_17 : f32 to vector<1x128xf32>
      %c0_18 = arith.constant 0 : index
      %c0_19 = arith.constant 0 : index
      %23 = vector.load %arg6[%c0_18, %c0_19] : memref<1x128xf32, #tpu.memory_space<vmem>>, vector<1x128xf32>
      tpu.vector_store %arg6[%c0_18, %c0_19], %22 {strides = array<i32>} : memref<1x128xf32, #tpu.memory_space<vmem>>, vector<1x128xf32>,
    } else {
    }
    %c0 = arith.constant 0 : index
    %c0_1 = arith.constant 0 : index
    %3 = vector.load %arg3[%c0, %c0_1] : memref<2x128xf32, #tpu.memory_space<vmem>>, vector<2x128xf32>
    %c0_2 = arith.constant 0 : index
    %c0_3 = arith.constant 0 : index
    %4 = vector.load %arg4[%c0_2, %c0_3] : memref<2x128xf32, #tpu.memory_space<vmem>>, vector<2x128xf32>
    %5 = arith.subf %3, %4 : vector<2x128xf32>
    %cst = arith.constant 1.000000e-10 : f32
    %6 = vector.broadcast %cst : f32 to vector<2x128xf32>
    %7 = arith.addf %5, %6 : vector<2x128xf32>
    %c0_4 = arith.constant 0 : index
    %c0_5 = arith.constant 0 : index
    %8 = vector.load %arg5[%c0_4, %c0_5] : memref<1x128xf32, #tpu.memory_space<vmem>>, vector<1x128xf32>
    %9 = arith.mulf %7, %7 : vector<2x128xf32>
    %cst_6 = arith.constant dense<0.000000e+00> : vector<128xf32>
    %10 = vector.multi_reduction <add>, %9, %cst_6 [0] : vector<2x128xf32> to vector<128xf32>
    %11 = vector.shape_cast %10 : vector<128xf32> to vector<1x128xf32>
    %12 = arith.addf %8, %11 : vector<1x128xf32>
    %c0_7 = arith.constant 0 : index
    %c0_8 = arith.constant 0 : index
    %13 = vector.load %arg5[%c0_7, %c0_8] : memref<1x128xf32, #tpu.memory_space<vmem>>, vector<1x128xf32>
    tpu.vector_store %arg5[%c0_7, %c0_8], %12 {strides = array<i32>} : memref<1x128xf32, #tpu.memory_space<vmem>>, vector<1x128xf32>,
    %c0_9 = arith.constant 0 : index
    %c0_10 = arith.constant 0 : index
    %14 = vector.load %arg6[%c0_9, %c0_10] : memref<1x128xf32, #tpu.memory_space<vmem>>, vector<1x128xf32>
    %15 = math.absf %7 : vector<2x128xf32>
    %cst_11 = arith.constant dense<0.000000e+00> : vector<128xf32>
    %16 = vector.multi_reduction <add>, %15, %cst_11 [0] : vector<2x128xf32> to vector<128xf32>
    %17 = vector.shape_cast %16 : vector<128xf32> to vector<1x128xf32>
    %18 = arith.addf %14, %17 : vector<1x128xf32>
    %c0_12 = arith.constant 0 : index
    %c0_13 = arith.constant 0 : index
    %19 = vector.load %arg6[%c0_12, %c0_13] : memref<1x128xf32, #tpu.memory_space<vmem>>, vector<1x128xf32>
    tpu.vector_store %arg6[%c0_12, %c0_13], %18 {strides = array<i32>} : memref<1x128xf32, #tpu.memory_space<vmem>>, vector<1x128xf32>,
    return
  }
  func.func @transform_0(%arg0: i32, %arg1: i32, %arg2: i32) -> (i32, i32) {
    %c1_i32 = arith.constant 1 : i32
    %0 = arith.muli %arg0, %c1_i32 : i32
    %1 = arith.addi %0, %arg2 : i32
    %c0_i32 = arith.constant 0 : i32
    return %1, %arg1 : i32, i32
  }
  func.func @transform_1(%arg0: i32, %arg1: i32, %arg2: i32) -> (i32, i32) {
    %c1_i32 = arith.constant 1 : i32
    %0 = arith.muli %arg0, %c1_i32 : i32
    %1 = arith.addi %0, %arg2 : i32
    %c0_i32 = arith.constant 0 : i32
    return %1, %arg1 : i32, i32
  }
  func.func @transform_2(%arg0: i32, %arg1: i32, %arg2: i32) -> (i32, i32) {
    %c1_i32 = arith.constant 1 : i32
    %0 = arith.muli %arg0, %c1_i32 : i32
    %1 = arith.addi %0, %arg1 : i32
    %c0_i32 = arith.constant 0 : i32
    %c0_i32_0 = arith.constant 0 : i32
    return %c0_i32, %1 : i32, i32
  }
  func.func @transform_3(%arg0: i32, %arg1: i32, %arg2: i32) -> (i32, i32) {
    %c1_i32 = arith.constant 1 : i32
    %0 = arith.muli %arg0, %c1_i32 : i32
    %1 = arith.addi %0, %arg1 : i32
    %c0_i32 = arith.constant 0 : i32
    %c0_i32_0 = arith.constant 0 : i32
    return %c0_i32, %1 : i32, i32
  }
}

</mosaic_0001>

<bundles_post_ra>
// kernel: tpu_custom_call.1
= control target key start
LH: loop header
LB: loop body
LE: loop exit
PB: predicated region body
PF: predicated region fallthrough
CT: control target
= control target key end

     0   :  { %9 = vsyncpa [#allocation3], 0  ;;  %s270_s0 = inlined_call_operand.hbm [shape: f32[2,128], index: 0, kind: input, shape index: {}]   ;;  %s271_s1 = inlined_call_operand.hbm [shape: f32[2,128], index: 1, kind: input, shape index: {}]   ;;  %s272_s2 = inlined_call_operand.hbm [shape: f32[1,128], index: 2, kind: output, shape index: {0}]   ;;  %s273_s3 = inlined_call_operand.hbm [shape: f32[1,128], index: 3, kind: output, shape index: {1}]  }
   0x1   :  { %10 = vsyncpa [#allocation6], 0 }
   0x2   :  { %11 = vsyncpa [#allocation4], 0 }
   0x3   :  { %12 = vsyncpa [#allocation9], 0  ;;  %s21_s14 = sshll.u32 %s270_s0, 4  ;;  %s233_s15 = smov [#allocation2]   ;;  %s22_s14 = int_to_ptr.hbm [resolvable:$true] %s21_s14 }
   0x4   :  { %s23_s16 = sshll.u32 %s233_s15, 4  ;;  %s35_s19 = sshll.u32 %s271_s1, 4  ;;  %s24_s16 = int_to_ptr.vmem [resolvable:$true] %s23_s16  ;;  %s36_s19 = int_to_ptr.hbm [resolvable:$true] %s35_s19 }
   0x5   :  { %26 = dma.hbm_to_vmem [thread:$0]  %s22_s14, 32, %s24_s16, [#allocation3]  }
   0x6   :  { %s234_s20 = smov [#allocation5]  }
   0x7   :  { %s37_s21 = sshll.u32 %s234_s20, 4  ;;  %s38_s21 = int_to_ptr.vmem [resolvable:$true] %s37_s21 }
   0x8   :  { %40 = dma.hbm_to_vmem [thread:$0]  %s36_s19, 32, %s38_s21, [#allocation6]  }
   0x9   :  { %225 = dma.done.wait [#allocation3], 32  }
   0xa   :  { %226 = vsyncadd [#allocation3], 4294967264 }
   0xb   :  { %227 = dma.done.wait [#allocation6], 32  }
   0xc   :  { %228 = vsyncadd [#allocation6], 4294967264  ;;  %v235_v0 = vmov 0.0   ;;  %v59_v1 = vld [vmem:[#allocation2] sm:$0x3]  ;;  %vm65_vm0 = vcmask 1041408  }
   0xd   :  { %57 = vst [vmem:[#allocation7] sm:$0x1] %v235_v0  ;;  %v60_v2 = vld [vmem:[#allocation5] sm:$0x3]  ;;  %s236_s0 = smov [#allocation7]   ;;  %s95_s24 = sshll.u32 %s272_s2, 4  ;;  %s96_s24 = int_to_ptr.hbm [resolvable:$true] %s95_s24 }
   0xe   :  { %58 = vst [vmem:[#allocation8] sm:$0x1] %v235_v0  ;;  %v61_v3 = vsub.f32 %v59_v1, %v60_v2  ;;  %s93_s1 = sshll.u32 %s236_s0, 4  ;;  %s237_s25 = smov [#allocation8]   ;;  %s94_s1 = int_to_ptr.vmem [resolvable:$true] %s93_s1 }
   0xf   :  { %s106_s26 = sshll.u32 %s237_s25, 4  ;;  %s108_s29 = sshll.u32 %s273_s3, 4  ;;  %s107_s26 = int_to_ptr.vmem [resolvable:$true] %s106_s26  ;;  %s109_s29 = int_to_ptr.hbm [resolvable:$true] %s108_s29 }
  0x10   :  { %v62_v4 = vadd.f32 1e-10, %v61_v3 }
  0x12   :  { %v64_v5 = vmul.f32 %v62_v4, %v62_v4  ;;  %v76_v6 = vand.u32 2147483647, %v62_v4 }
  0x14   :  { %v66_v7 = vsel %vm65_vm0, %v64_v5, 0.0  ;;  %v77_v8 = vsel %vm65_vm0, %v76_v6, 0.0  ;;  %v63_v19 = vld [vmem:[#allocation7] sm:$0x1] }
  0x15   :  { %v67_v9 = vrot.slane %v66_v7, 4  ;;  %v78_v10 = vrot.slane %v77_v8, 4  ;;  %v75_v20 = vld [vmem:[#allocation8] sm:$0x1] }
  0x17   :  { %v68_v11 = vadd.f32 %v67_v9, %v66_v7  ;;  %v79_v12 = vadd.f32 %v78_v10, %v77_v8 }
  0x19   :  { %v69_v13 = vrot.slane %v68_v11, 2  ;;  %v80_v14 = vrot.slane %v79_v12, 2 }
  0x1b   :  { %v70_v15 = vadd.f32 %v69_v13, %v68_v11  ;;  %v81_v16 = vadd.f32 %v80_v14, %v79_v12 }
  0x1d   :  { %v71_v17 = vrot.slane %v70_v15, 1  ;;  %v82_v18 = vrot.slane %v81_v16, 1 }
  0x1f   :  { %v72_v21 = vadd.f32 %v71_v17, %v70_v15  ;;  %v83_v22 = vadd.f32 %v82_v18, %v81_v16 }
  0x21   :  { %v73_v23 = vadd.f32 %v72_v21, %v63_v19  ;;  %v84_v24 = vadd.f32 %v83_v22, %v75_v20 }
  0x23   :  { %74 = vst [vmem:[#allocation7] sm:$0x1] %v73_v23 }
  0x24   :  { %85 = vst [vmem:[#allocation8] sm:$0x1] %v84_v24  ;;  %98 = dma.vmem_to_hbm [thread:$0]  %s94_s1, 16, %s96_s24, [#allocation4]  }
  0x25   :  { %111 = dma.vmem_to_hbm [thread:$0]  %s107_s26, 16, %s109_s29, [#allocation9]  }
  0x26   :  { %229 = dma.done.wait [#allocation4], 16  }
  0x27   :  { %230 = vsyncadd [#allocation4], 4294967280 }
  0x28   :  { %231 = dma.done.wait [#allocation9], 16  }
  0x29   :  { %232 = vsyncadd [#allocation9], 4294967280 }
  0x2a   :  { %120 = vsyncpa [#allocation3], 1 }
  0x2b   :  { %121 = vsyncpa [#allocation6], 1 }
  0x2c   :  { %122 = vsyncpa [#allocation4], 1 }
  0x2d   :  { %123 = vsyncpa [#allocation9], 1 }

</bundles_post_ra>
